<compile_context>
chip_gen: v6e
topology: v6e:2x2x1
jax: 0.10.0
libtpu: 0.0.40
codegen_flags: <defaults>
</compile_context>

<pallas_src>
import jax
import jax.numpy as jnp
from jax.experimental import pallas as pl
from jax.experimental.pallas import tpu as pltpu


def _embedding_max_norm_renorm(rows, max_norm=1.0, eps=1e-7):
    """PyTorch nn.Embedding(max_norm=True) renormalizes accessed rows to L2-norm <= 1."""
    norm = jnp.sqrt(jnp.sum(rows * rows, axis=-1, keepdims=True))
    scale = jnp.where(norm > max_norm, max_norm / (norm + eps), 1.0)
    return rows * scale


def _add_encoding_kernel(x_ref, add_ref, o_ref):
    # x_ref/o_ref: (TB, N) lane-dense block; add_ref: (1, N) resident addend row.
    # Plain sublane broadcast add — no per-step broadcast_in_dim.
    o_ref[...] = x_ref[...] + add_ref[...]


def _choose_batch_tile(B, row_bytes, target_bytes=4 * 1024 * 1024):
    """Rows per block, targeting ~4 MiB blocks (HBM-roofline sweet spot on all gens).

    Keeps blocks sublane-aligned (rows a multiple of 8, or the full batch) and prefers
    >=2 grid steps when the batch is big enough so v7x's two TensorCores both get work.
    """
    tb = max(1, target_bytes // max(row_bytes, 1))
    if tb >= B:
        # Whole batch fits in one ~target-sized block. Split into two grid steps for
        # megacore only if the halves stay sublane-aligned.
        if B >= 16 and (B // 2) % 8 == 0:
            return B // 2
        return B
    # Multi-step grid: round to a multiple of 8 rows for aligned vld/vst.
    tb = 8 if tb < 8 else (tb // 8) * 8
    return min(tb, B)


def learned_encoding_traj(x, seq_weight, person_weight, num_people, *, use_pallas=None):
    """Equivalent of LearnedEncoding.forward(x, num_people, type='traj') in eval mode."""
    B, S, P, D = x.shape
    assert P == num_people, "x people axis must match num_people"
    assert D % 2 == 0
    d_half = D // 2
    N = S * P * D
    itemsize = jnp.dtype(x.dtype).itemsize

    # --- glue: embedding gather (arange indices -> slice) + max_norm renorm ---
    max_seq_len = seq_weight.shape[0]
    seq_idx = jnp.minimum(jnp.arange(S), max_seq_len - 1)                              # torch.clamp
    seq_enc = _embedding_max_norm_renorm(seq_weight[seq_idx])[:, :d_half]              # (S, D/2)
    per_enc = _embedding_max_norm_renorm(person_weight[jnp.arange(num_people)])[:, :d_half]  # (P, D/2)

    # Combined addend: addend[s, p, d] = seq_enc[s, d] for d < D/2, per_enc[p, d-D/2] otherwise.
    seq_part = jnp.broadcast_to(seq_enc[:, None, :], (S, P, d_half))
    per_part = jnp.broadcast_to(per_enc[None, :, :], (S, P, d_half))
    addend = jnp.concatenate([seq_part, per_part], axis=-1).reshape(1, N).astype(x.dtype)

    x_flat = x.reshape(B, N)

    # Small-input fallback: kernel launch + pipeline setup dominates below ~2 MiB.
    total_bytes = B * N * itemsize
    if use_pallas is None:
        use_pallas = total_bytes >= (2 * 1024 * 1024)
    if not use_pallas:
        return (x_flat + addend).reshape(B, S, P, D)

    tb = _choose_batch_tile(B, N * itemsize)

    out = pl.pallas_call(
        _add_encoding_kernel,
        out_shape=jax.ShapeDtypeStruct((B, N), x.dtype),
        grid=(pl.cdiv(B, tb),),                      # ragged last block handled by masking
        in_specs=[
            pl.BlockSpec((tb, N), lambda i: (i, 0)),
            pl.BlockSpec((1, N), lambda i: (0, 0)),  # constant block index -> resident addend
        ],
        out_specs=pl.BlockSpec((tb, N), lambda i: (i, 0)),
        input_output_aliases={0: 0},
        compiler_params=pltpu.CompilerParams(
            dimension_semantics=("parallel",),       # shard batch grid across TCs (v7x)
            vmem_limit_bytes=64 * 1024 * 1024,       # lift v5e 16 MiB / v6e 32 MiB defaults
        ),
    )(x_flat, addend)

    return out.reshape(B, S, P, D)


def _reference(x, seq_weight, person_weight, num_people):
    B, S, P, D = x.shape
    d_half = D // 2
    seq_idx = jnp.minimum(jnp.arange(S), seq_weight.shape[0] - 1)
    seq_enc = _embedding_max_norm_renorm(seq_weight[seq_idx])[:, :d_half]
    per_enc = _embedding_max_norm_renorm(person_weight[jnp.arange(num_people)])[:, :d_half]
    first = x[..., :d_half] + seq_enc[None, :, None, :]
    second = x[..., d_half:] + per_enc[None, None, :, :]
    return jnp.concatenate([first, second], axis=-1)


if __name__ == "__main__":
    # Module config (small, consistent with forward): d_model=32, seq_len=8, num_people=4
    d_model, seq_len, num_people = 32, 8, 4

    key = jax.random.PRNGKey(0)
    k_seq, k_per, k_x, k_x2 = jax.random.split(key, 4)
    # nn.Embedding default init: N(0, 1)
    seq_weight = jax.random.normal(k_seq, (seq_len + 1, d_model), dtype=jnp.float32)
    person_weight = jax.random.normal(k_per, (num_people, d_model), dtype=jnp.float32)

    # 1) Tiny demo shape (batch=2): single full-batch block, force the Pallas path.
    x = jax.random.normal(k_x, (2, seq_len, num_people, d_model), dtype=jnp.float32)
    out = learned_encoding_traj(x, seq_weight, person_weight, num_people, use_pallas=True)
    out = jax.block_until_ready(out)
    ref = _reference(x, seq_weight, person_weight, num_people)
    assert out.shape == x.shape and out.dtype == x.dtype
    assert jnp.allclose(out, ref, atol=1e-5, rtol=1e-5), "mismatch vs reference (B=2)"

    # 2) Slightly larger batch (still small) to exercise the multi-step, 2-TC-friendly grid.
    x2 = jax.random.normal(k_x2, (64, seq_len, num_people, d_model), dtype=jnp.float32)
    out2 = learned_encoding_traj(x2, seq_weight, person_weight, num_people, use_pallas=True)
    out2 = jax.block_until_ready(out2)
    ref2 = _reference(x2, seq_weight, person_weight, num_people)
    assert jnp.allclose(out2, ref2, atol=1e-5, rtol=1e-5), "mismatch vs reference (B=64)"

    print("KERNEL_OK")
</pallas_src>

<mosaic_0001>
module attributes {stable_mosaic.version = 11 : i64} {
  func.func @_add_encoding_kernel(%arg0: i32, %arg1: memref<2x1024xf32, #tpu.memory_space<vmem>>, %arg2: memref<1x1024xf32, #tpu.memory_space<vmem>>, %arg3: memref<2x1024xf32, #tpu.memory_space<vmem>>) attributes {dimension_semantics = [#tpu.dimension_semantics<parallel>], iteration_bounds = array<i64: 1>, scalar_prefetch = 0 : i64, scratch_operands = 0 : i64, tpu.core_type = #tpu.core_type<tc>, window_params = [{transform_indices = @transform_0, window_bounds = array<i64: 2, 1024>}, {pipeline_mode = #tpu.pipeline_mode<synchronous>, transform_indices = @transform_1, window_bounds = array<i64: 1, 1024>}, {transform_indices = @transform_2, window_bounds = array<i64: 2, 1024>}]} {
    %c0 = arith.constant 0 : index
    %c0_0 = arith.constant 0 : index
    %0 = vector.load %arg1[%c0, %c0_0] : memref<2x1024xf32, #tpu.memory_space<vmem>>, vector<2x1024xf32>
    %c0_1 = arith.constant 0 : index
    %c0_2 = arith.constant 0 : index
    %1 = vector.load %arg2[%c0_1, %c0_2] : memref<1x1024xf32, #tpu.memory_space<vmem>>, vector<1x1024xf32>
    %2 = vector.broadcast %1 : vector<1x1024xf32> to vector<2x1024xf32>
    %3 = arith.addf %0, %2 : vector<2x1024xf32>
    %c0_3 = arith.constant 0 : index
    %c0_4 = arith.constant 0 : index
    %4 = vector.load %arg3[%c0_3, %c0_4] : memref<2x1024xf32, #tpu.memory_space<vmem>>, vector<2x1024xf32>
    tpu.vector_store %arg3[%c0_3, %c0_4], %3 {strides = array<i32>} : memref<2x1024xf32, #tpu.memory_space<vmem>>, vector<2x1024xf32>,
    return
  }
  func.func @transform_0(%arg0: i32) -> (i32, i32) {
    %c0_i32 = arith.constant 0 : i32
    %c0_i32_0 = arith.constant 0 : i32
    return %arg0, %c0_i32 : i32, i32
  }
  func.func @transform_1(%arg0: i32) -> (i32, i32) {
    %c0_i32 = arith.constant 0 : i32
    %c0_i32_0 = arith.constant 0 : i32
    %c0_i32_1 = arith.constant 0 : i32
    return %c0_i32, %c0_i32_0 : i32, i32
  }
  func.func @transform_2(%arg0: i32) -> (i32, i32) {
    %c0_i32 = arith.constant 0 : i32
    %c0_i32_0 = arith.constant 0 : i32
    return %arg0, %c0_i32 : i32, i32
  }
}

</mosaic_0001>

<bundles_post_ra>
// kernel: tpu_custom_call.1
= control target key start
LH: loop header
LB: loop body
LE: loop exit
PB: predicated region body
PF: predicated region fallthrough
CT: control target
= control target key end

     0   :  { %7 = vsyncpa [#allocation3], 0  ;;  %s189_s0 = inlined_call_operand.hbm [shape: f32[2,1024], index: 0, kind: input, shape index: {}, may-alias: {0,2}]   ;;  %s190_s1 = inlined_call_operand.vmem [shape: f32[1,1024], index: 1, kind: input, shape index: {}]   ;;  %s191_s2 = inlined_call_operand.hbm [shape: f32[2,1024], index: 2, kind: output, shape index: {}, may-alias: {0,2}]  }
   0x1   :  { %8 = vsyncpa [#allocation4], 0  ;;  %s162_s9 = smov [#allocation2]  }
   0x2   :  { %s15_s10 = sshll.u32 %s162_s9, 4  ;;  %s16_s10 = int_to_ptr.vmem [resolvable:$true] %s15_s10 }
   0x3   :  { %s126_s11 = scalar_lea.vmem %s16_s10, 256  ;;  %p131_p1 = scmp.lt.s32.totalorder %s16_s10, %s16_s10 }
   0x4   :  { %p127_p0 = scmp.ne.s32.totalorder %s16_s10, %s126_s11  ;;  %p132_p2 = scmp.lt.s32.totalorder %s126_s11, %s126_s11 }
   0x6   :  { %p133_p3 = por %p132_p2, %p131_p1 }
   0x8   :  { %p134_p4 = pnand %p133_p3, %p127_p0 }
   0xa   :  { %137 = shalt.err (!%p134_p4)
}
   0xb   :  { %18 = dma.hbm_to_vmem [thread:$0]  %s189_s0, 256, %s16_s10, [#allocation3]  }
   0xc   :  { %158 = dma.done.wait [#allocation3], 256  }
   0xd   :  { %159 = vsyncadd [#allocation3], 4294967040  ;;  %v28_v0 = vlaneseq  ;;  %v163_v1 = vmov 1983009808   ;;  %v26_v13 = vld [vmem:[%s190_s1] sm:$0xff]  ;;  %v25_v33 = vld [vmem:[#allocation2 + $0x8] sm:$0xff] }
   0xe   :  { %v63_v2 = vunpack.c.l.s4 %v163_v1  ;;  %v24_v29 = vld [vmem:[#allocation2] sm:$0xff]  ;;  %s164_s0 = smov [#allocation5]  }
   0xf   :  { %v29_v3 = vshrl.u32 %v28_v0, 7  ;;  %s106_s1 = sshll.u32 %s164_s0, 4  ;;  %s107_s1 = int_to_ptr.vmem [resolvable:$true] %s106_s1 }
  0x10   :  { %v64_v4 = vunpack.c.0.s8 %v63_v2  ;;  %s138_s16 = scalar_lea.vmem %s107_s1, 256  ;;  %p143_p6 = scmp.lt.s32.totalorder %s107_s1, %s107_s1 }
  0x11   :  { %v30_v5 = vsub.s32 0, %v29_v3  ;;  %v34_v6 = vsub.s32 1, %v29_v3  ;;  %v38_v7 = vsub.s32 2, %v29_v3  ;;  %v42_v8 = vsub.s32 3, %v29_v3  ;;  %p139_p5 = scmp.ne.s32.totalorder %s107_s1, %s138_s16  ;;  %p144_p7 = scmp.lt.s32.totalorder %s138_s16, %s138_s16 }
  0x12   :  { %v46_v9 = vsub.s32 4, %v29_v3  ;;  %v50_v10 = vsub.s32 5, %v29_v3  ;;  %v54_v11 = vsub.s32 6, %v29_v3  ;;  %v58_v12 = vsub.s32 7, %v29_v3 }
  0x13   :  { %v67_v14 = vsub.s32 %v64_v4, %v29_v3  ;;  %v31_v15 = vrot.slane %v26_v13, %v30_v5  ;;  %v35_v16 = vrot.slane %v26_v13, %v34_v6  ;;  %v39_v17 = vrot.slane %v26_v13, %v38_v7  ;;  %p145_p8 = por %p144_p7, %p143_p6 }
  0x14   :  { %v43_v18 = vrot.slane %v26_v13, %v42_v8  ;;  %v47_v19 = vrot.slane %v26_v13, %v46_v9  ;;  %v51_v20 = vrot.slane %v26_v13, %v50_v10  ;;  %v55_v21 = vrot.slane %v26_v13, %v54_v11 }
  0x15   :  { %v59_v22 = vrot.slane %v26_v13, %v58_v12  ;;  %v60_v23 = vcombine.low %v31_v15, %v35_v16  ;;  %p146_p9 = pnand %p145_p8, %p139_p5 }
  0x16   :  { %v61_v24 = vcombine.low %v39_v17, %v43_v18  ;;  %v77_v25 = vcombine.low %v47_v19, %v51_v20 }
  0x17   :  { %v78_v26 = vcombine.low %v55_v21, %v59_v22  ;;  %v68_v27 = vrot.slane %v60_v23, %v67_v14 }
  0x18   :  { %v75_v28 = vrot.slane %v61_v24, %v67_v14  ;;  %v85_v30 = vrot.slane %v77_v25, %v67_v14 }
  0x19   :  { %v92_v31 = vrot.slane %v78_v26, %v67_v14 }
  0x1a   :  { %v76_v32 = vcombine.low %v68_v27, %v75_v28 }
  0x1b   :  { %v93_v34 = vcombine.low %v85_v30, %v92_v31 }
  0x1c   :  { %v96_v35 = vadd.f32 %v76_v32, %v24_v29 }
  0x1d   :  { %v97_v36 = vadd.f32 %v93_v34, %v25_v33 }
  0x1e   :  { %98 = vst [vmem:[#allocation5] sm:$0xff] %v96_v35 }
  0x1f   :  { %99 = vst [vmem:[#allocation5 + $0x8] sm:$0xff] %v97_v36 }
  0x20   :  { %149 = shalt.err (!%p146_p9)
}
  0x21   :  { %109 = dma.vmem_to_hbm [thread:$0]  %s107_s1, 256, %s191_s2, [#allocation4]  }
  0x22   :  { %160 = dma.done.wait [#allocation4], 256  }
  0x23   :  { %161 = vsyncadd [#allocation4], 4294967040 }
  0x24   :  { %113 = vsyncpa [#allocation3], 1 }
  0x25   :  { %114 = vsyncpa [#allocation4], 1 }

</bundles_post_ra>
